<compile_context>
chip_gen: v6e
topology: v6e:2x2x1
jax: 0.10.0
libtpu: 0.0.40
codegen_flags: <defaults>
</compile_context>

<pallas_src>
import functools

import jax
import jax.numpy as jnp
from jax.experimental import pallas as pl
from jax.experimental.pallas import tpu as pltpu


def _text_encoder_kernel(labels_ref, t1_ref, w2_ref, b2_ref, out_ref):
    tb = labels_ref.shape[0]
    n_vocab = t1_ref.shape[0]

    # In-kernel one-hot: (iota == label) -> [TB, 10] bf16.  The MXU matmul
    # against the folded [10, 512] table is then an exact row gather (one-hot
    # entries are exactly 0/1, f32 accumulation).
    # NOTE: out-of-range labels give an all-zero one-hot row (bias-only
    # output) instead of erroring like nn.Embedding.
    iota = jax.lax.broadcasted_iota(jnp.int32, (tb, n_vocab), 1)
    onehot = (iota == labels_ref[...]).astype(t1_ref.dtype)           # [TB, 10]
    h = jnp.dot(onehot, t1_ref[...],
                preferred_element_type=jnp.float32)                   # [TB, 512] f32

    # Swish in f32 (VPU/EUP path, valid on v5e); cast to bf16 only at the MXU.
    h = h * jax.nn.sigmoid(h)

    # Final head into the lane-dense padded output slab (unmasked stores).
    out_ref[...] = (jnp.dot(h.astype(w2_ref.dtype), w2_ref[...],
                            preferred_element_type=jnp.float32)
                    + b2_ref[...])


def prepare_params(params, n_latents):
    """Fold Embedding -> Swish -> Linear(512,512) into a [10,512] table (its
    input only ever takes 10 values), cast streamed weights to bf16, and
    zero-pad the output head to a 128-lane multiple.  Run ONCE per weight
    update, outside the hot path."""
    emb, w1, b1, w2, b2 = params
    h = emb * jax.nn.sigmoid(emb)                                     # swish(emb[v]) f32
    t1 = jnp.dot(h, w1, preferred_element_type=jnp.float32) + b1      # [10, 512] f32

    d_out = 2 * n_latents
    d_out_pad = 128 * pl.cdiv(d_out, 128)
    w2p = jnp.zeros((w2.shape[0], d_out_pad), jnp.float32).at[:, :d_out].set(w2)
    b2p = jnp.zeros((1, d_out_pad), jnp.float32).at[:, :d_out].set(b2)
    return (t1.astype(jnp.bfloat16),
            w2p.astype(jnp.bfloat16),
            b2p.astype(jnp.float32))


def _resident_spec_kwargs():
    # Constant index_map => double-buffering buys nothing; single-buffer the
    # resident weights when this Pallas version supports pipeline_mode.
    if hasattr(pl, "Buffered"):
        try:
            pl.BlockSpec((8, 128), lambda i: (0, 0), pipeline_mode=pl.Buffered(1))
            return {"pipeline_mode": pl.Buffered(1)}
        except TypeError:
            pass
    return {}


def text_encoder_forward(x_int, prepped, *, n_latents):
    """x_int: int [B] class labels in [0, 10). Returns (mu, logvar)."""
    t1, w2p, b2p = prepped
    B = x_int.shape[0]
    n_vocab, d_emb = t1.shape           # (10, 512)
    d_out_pad = w2p.shape[1]            # 128-multiple

    # Batch tile: sublane-aligned, capped at 1024 (a multiple of 128 so MXU
    # M-passes stay aligned on v5e).  Live activations per tile are only a
    # few MB even at TB=1024, well inside scoped VMEM on v5e/v6e/v7x.
    B_sub = 8 * pl.cdiv(B, 8)
    TB = min(1024, B_sub)
    n_tiles = pl.cdiv(B_sub, TB)
    B_pad = n_tiles * TB

    labels = x_int.astype(jnp.int32).reshape(B, 1)
    if B_pad != B:
        labels = jnp.pad(labels, ((0, B_pad - B), (0, 0)))

    resident = _resident_spec_kwargs()

    out = pl.pallas_call(
        _text_encoder_kernel,
        out_shape=jax.ShapeDtypeStruct((B_pad, d_out_pad), jnp.float32),
        grid=(n_tiles,),
        in_specs=[
            pl.BlockSpec((TB, 1), lambda i: (i, 0)),                        # labels (tiled)
            pl.BlockSpec((n_vocab, d_emb), lambda i: (0, 0), **resident),   # t1 (resident)
            pl.BlockSpec((d_emb, d_out_pad), lambda i: (0, 0), **resident), # w2 (resident)
            pl.BlockSpec((1, d_out_pad), lambda i: (0, 0), **resident),     # b2 (resident)
        ],
        out_specs=pl.BlockSpec((TB, d_out_pad), lambda i: (i, 0)),
        compiler_params=pltpu.CompilerParams(
            # Only shard over megacore (v7x) when there is >1 tile of batch
            # work; otherwise both TCs would just duplicate the weight DMA.
            dimension_semantics=("parallel",) if n_tiles >= 2 else ("arbitrary",)),
    )(labels, t1, w2p, b2p)

    out = out[:B]
    return out[:, :n_latents], out[:, n_latents:2 * n_latents]


def init_params(key, n_latents):
    """Deterministic synthetic parameters matching the PyTorch module shapes."""
    k_emb, k_w1, k_b1, k_w2, k_b2 = jax.random.split(key, 5)
    emb = jax.random.normal(k_emb, (10, 512), jnp.float32) * 0.05
    # PyTorch Linear stores weight as [out, in]; we keep [in, out] for x @ W.
    w1 = jax.random.normal(k_w1, (512, 512), jnp.float32) * 0.02
    b1 = jax.random.normal(k_b1, (1, 512), jnp.float32) * 0.01
    w2 = jax.random.normal(k_w2, (512, 2 * n_latents), jnp.float32) * 0.02
    b2 = jax.random.normal(k_b2, (1, 2 * n_latents), jnp.float32) * 0.01
    return emb, w1, b1, w2, b2


if __name__ == "__main__":
    n_latents = 32
    batch = 8

    key = jax.random.PRNGKey(0)
    k_params, k_x = jax.random.split(key)
    params = init_params(k_params, n_latents)
    x = jax.random.randint(k_x, (batch,), 0, 10, dtype=jnp.int32)

    prepped = prepare_params(params, n_latents)
    fwd = jax.jit(functools.partial(text_encoder_forward, n_latents=n_latents))
    mu, logvar = fwd(x, prepped)
    jax.block_until_ready((mu, logvar))

    # Pure-JAX reference with the same folded / bf16-weight numerics.
    emb, w1, b1, w2, b2 = params
    t1_ref = (jnp.dot(emb * jax.nn.sigmoid(emb), w1,
                      preferred_element_type=jnp.float32) + b1).astype(jnp.bfloat16)
    h = t1_ref[x].astype(jnp.float32)
    h = h * jax.nn.sigmoid(h)
    ref = jnp.dot(h.astype(jnp.bfloat16), w2.astype(jnp.bfloat16),
                  preferred_element_type=jnp.float32) + b2

    assert mu.shape == (batch, n_latents) and logvar.shape == (batch, n_latents)
    assert jnp.allclose(mu, ref[:, :n_latents], atol=2e-3, rtol=2e-2)
    assert jnp.allclose(logvar, ref[:, n_latents:], atol=2e-3, rtol=2e-2)

    print("KERNEL_OK")
</pallas_src>

<mosaic_0001>
module attributes {stable_mosaic.version = 11 : i64} {
  func.func @_text_encoder_kernel(%arg0: i32, %arg1: memref<8x1xi32, #tpu.memory_space<vmem>>, %arg2: memref<10x512xbf16, #tpu.memory_space<vmem>>, %arg3: memref<512x128xbf16, #tpu.memory_space<vmem>>, %arg4: memref<1x128xf32, #tpu.memory_space<vmem>>, %arg5: memref<8x128xf32, #tpu.memory_space<vmem>>) attributes {dimension_semantics = [#tpu.dimension_semantics<arbitrary>], iteration_bounds = array<i64: 1>, scalar_prefetch = 0 : i64, scratch_operands = 0 : i64, tpu.core_type = #tpu.core_type<tc>, window_params = [{transform_indices = @transform_0, window_bounds = array<i64: 8, 1>}, {pipeline_mode = #tpu.pipeline_mode<synchronous>, transform_indices = @transform_1, window_bounds = array<i64: 10, 512>}, {pipeline_mode = #tpu.pipeline_mode<synchronous>, transform_indices = @transform_2, window_bounds = array<i64: 512, 128>}, {pipeline_mode = #tpu.pipeline_mode<synchronous>, transform_indices = @transform_3, window_bounds = array<i64: 1, 128>}, {transform_indices = @transform_4, window_bounds = array<i64: 8, 128>}]} {
    %0 = tpu.iota {dimensions = array<i32: 1>} : vector<8x10xi32>
    %c0 = arith.constant 0 : index
    %c0_0 = arith.constant 0 : index
    %1 = vector.load %arg1[%c0, %c0_0] : memref<8x1xi32, #tpu.memory_space<vmem>>, vector<8x1xi32>
    %2 = vector.broadcast %1 : vector<8x1xi32> to vector<8x10xi32>
    %3 = arith.cmpi eq, %0, %2 : vector<8x10xi32>
    %4 = arith.extui %3 : vector<8x10xi1> to vector<8x10xi32>
    %5 = arith.sitofp %4 : vector<8x10xi32> to vector<8x10xf32>
    %6 = arith.truncf %5 : vector<8x10xf32> to vector<8x10xbf16>
    %c0_1 = arith.constant 0 : index
    %c0_2 = arith.constant 0 : index
    %7 = vector.load %arg2[%c0_1, %c0_2] : memref<10x512xbf16, #tpu.memory_space<vmem>>, vector<10x512xbf16>
    %cst = arith.constant dense<0.000000e+00> : vector<8x512xf32>
    %8 = tpu.matmul %6, %7, %cst {dimension_numbers = #tpu.dot_dimension_numbers<[1], [0], [0], [1], [0, 0, 1, 1], [], []>} : vector<8x10xbf16>, vector<10x512xbf16>, vector<8x512xf32> -> vector<8x512xf32>
    %9 = arith.negf %8 : vector<8x512xf32>
    %10 = math.exp %9 : vector<8x512xf32>
    %cst_3 = arith.constant 1.000000e+00 : f32
    %11 = vector.broadcast %cst_3 : f32 to vector<8x512xf32>
    %12 = arith.addf %11, %10 : vector<8x512xf32>
    %13 = arith.divf %11, %12 : vector<8x512xf32>
    %14 = arith.mulf %8, %13 : vector<8x512xf32>
    %15 = arith.truncf %14 : vector<8x512xf32> to vector<8x512xbf16>
    %c0_4 = arith.constant 0 : index
    %c0_5 = arith.constant 0 : index
    %16 = vector.load %arg3[%c0_4, %c0_5] : memref<512x128xbf16, #tpu.memory_space<vmem>>, vector<512x128xbf16>
    %cst_6 = arith.constant dense<0.000000e+00> : vector<8x128xf32>
    %17 = tpu.matmul %15, %16, %cst_6 {dimension_numbers = #tpu.dot_dimension_numbers<[1], [0], [0], [1], [0, 0, 1, 1], [], []>} : vector<8x512xbf16>, vector<512x128xbf16>, vector<8x128xf32> -> vector<8x128xf32>
    %c0_7 = arith.constant 0 : index
    %c0_8 = arith.constant 0 : index
    %18 = vector.load %arg4[%c0_7, %c0_8] : memref<1x128xf32, #tpu.memory_space<vmem>>, vector<1x128xf32>
    %19 = vector.broadcast %18 : vector<1x128xf32> to vector<8x128xf32>
    %20 = arith.addf %17, %19 : vector<8x128xf32>
    %c0_9 = arith.constant 0 : index
    %c0_10 = arith.constant 0 : index
    %21 = vector.load %arg5[%c0_9, %c0_10] : memref<8x128xf32, #tpu.memory_space<vmem>>, vector<8x128xf32>
    tpu.vector_store %arg5[%c0_9, %c0_10], %20 {strides = array<i32>} : memref<8x128xf32, #tpu.memory_space<vmem>>, vector<8x128xf32>,
    return
  }
  func.func @transform_0(%arg0: i32) -> (i32, i32) {
    %c0_i32 = arith.constant 0 : i32
    %c0_i32_0 = arith.constant 0 : i32
    return %arg0, %c0_i32 : i32, i32
  }
  func.func @transform_1(%arg0: i32) -> (i32, i32) {
    %c0_i32 = arith.constant 0 : i32
    %c0_i32_0 = arith.constant 0 : i32
    %c0_i32_1 = arith.constant 0 : i32
    return %c0_i32, %c0_i32_0 : i32, i32
  }
  func.func @transform_2(%arg0: i32) -> (i32, i32) {
    %c0_i32 = arith.constant 0 : i32
    %c0_i32_0 = arith.constant 0 : i32
    %c0_i32_1 = arith.constant 0 : i32
    return %c0_i32, %c0_i32_0 : i32, i32
  }
  func.func @transform_3(%arg0: i32) -> (i32, i32) {
    %c0_i32 = arith.constant 0 : i32
    %c0_i32_0 = arith.constant 0 : i32
    %c0_i32_1 = arith.constant 0 : i32
    return %c0_i32, %c0_i32_0 : i32, i32
  }
  func.func @transform_4(%arg0: i32) -> (i32, i32) {
    %c0_i32 = arith.constant 0 : i32
    %c0_i32_0 = arith.constant 0 : i32
    return %arg0, %c0_i32 : i32, i32
  }
}

</mosaic_0001>

<bundles_post_ra>
// kernel: text_encoder_forward.1
= control target key start
LH: loop header
LB: loop body
LE: loop exit
PB: predicated region body
PF: predicated region fallthrough
CT: control target
= control target key end

     0   :  { %9 = vsyncpa [#allocation3], 0  ;;  %s802_s0 = inlined_call_operand.vmem [shape: s32[8,1], index: 0, kind: input, shape index: {}]   ;;  %s803_s1 = inlined_call_operand.hbm [shape: bf16[10,512], index: 1, kind: input, shape index: {}]   ;;  %s804_s2 = inlined_call_operand.hbm [shape: bf16[512,128], index: 2, kind: input, shape index: {}]   ;;  %s805_s3 = inlined_call_operand.vmem [shape: f32[1,128], index: 3, kind: input, shape index: {}]   ;;  %s806_s4 = inlined_call_operand.vmem [shape: f32[8,128], index: 4, kind: output, shape index: {}]  }
   0x1   :  { %10 = vsyncpa [#allocation5], 0  ;;  %s754_s15 = smov [#allocation2]  }
   0x2   :  { %s18_s16 = sshll.u32 %s754_s15, 4  ;;  %s19_s16 = int_to_ptr.vmem [resolvable:$true] %s18_s16 }
   0x3   :  { %s718_s17 = scalar_lea.vmem %s19_s16, 512  ;;  %p723_p1 = scmp.lt.s32.totalorder %s19_s16, %s19_s16 }
   0x4   :  { %p719_p0 = scmp.ne.s32.totalorder %s19_s16, %s718_s17  ;;  %p724_p2 = scmp.lt.s32.totalorder %s718_s17, %s718_s17 }
   0x6   :  { %p725_p3 = por %p724_p2, %p723_p1 }
   0x8   :  { %p726_p4 = pnand %p725_p3, %p719_p0 }
   0xa   :  { %729 = shalt.err (!%p726_p4)
}
   0xb   :  { %s755_s18 = smov 256   ;;  %s756_s19 = smov 16  }
   0xc   :  { %24 = dma.hbm_to_vmem [thread:$0]  %s803_s1, 512, %s19_s16, [#allocation3], %s755_s18, %s755_s18, %s756_s19  }
   0xd   :  { %s757_s22 = smov [#allocation4]  }
   0xe   :  { %s30_s23 = sshll.u32 %s757_s22, 4  ;;  %s31_s23 = int_to_ptr.vmem [resolvable:$true] %s30_s23 }
   0xf   :  { %s738_s24 = scalar_lea.vmem %s31_s23, 4096  ;;  %p743_p6 = scmp.lt.s32.totalorder %s31_s23, %s31_s23 }
  0x10   :  { %p739_p5 = scmp.ne.s32.totalorder %s31_s23, %s738_s24  ;;  %p744_p7 = scmp.lt.s32.totalorder %s738_s24, %s738_s24 }
  0x12   :  { %p745_p8 = por %p744_p7, %p743_p6 }
  0x14   :  { %p746_p9 = pnand %p745_p8, %p739_p5 }
  0x16   :  { %749 = shalt.err (!%p746_p9)
}
  0x17   :  { %s758_s25 = smov 64   ;;  %s759_s26 = smov 4  }
  0x18   :  { %36 = dma.hbm_to_vmem [thread:$0]  %s804_s2, 4096, %s31_s23, [#allocation5], %s758_s25, %s758_s25, %s759_s26  }
  0x19   :  { %750 = dma.done.wait [#allocation3], 512  }
  0x1a   :  { %751 = vsyncadd [#allocation3], 4294966784 }
  0x1b   :  { %752 = dma.done.wait [#allocation5], 4096  }
  0x1c   :  { %753 = vsyncadd [#allocation5], 4294963200  ;;  %v760_v0 = vmov 0   ;;  %v48_v1 = vld [vmem:[%s802_s0] sm:$0xff]  ;;  %vm80_vm0 = vcmask 1044480   ;;  %v46_v8 = vlaneseq  ;;  %v761_v11 = vmov 0.0  }
  0x1d   :  { %655 = vset.pattern.permute.xlu0 %v760_v0  ;;  %125 = vmatprep.mubr.bf16.mxu0 %v760_v0  ;;  %v656_v2 = vld [vmem:[#allocation2 + $0x4] ss:$16 sps:$4 sm:$0x1f]   ;;  %v658_v3 = vld [vmem:[#allocation2 + $0xc] ss:$16 sps:$4 sm:$0x1f]  }
  0x1e   :  { %166 = vmatprep.mubr.bf16.mxu1 %v760_v0  ;;  %50 = vperm.xlu0 %655, %v48_v1   ;;  %v660_v4 = vld [vmem:[#allocation2] ss:$16 sps:$4 sm:$0x1f]   ;;  %v661_v5 = vld [vmem:[#allocation2 + $0x8] ss:$16 sps:$4 sm:$0x1f]  }
  0x1f   :  { %562 = vmatprep.subr.msk.bf16.mxu0 %vm80_vm0, %v656_v2  ;;  %564 = vmatprep.subr.msk.bf16.mxu1 %vm80_vm0, %v658_v3  ;;  %v82_v6 = vsel %vm80_vm0, %v660_v4, 0  ;;  %v88_v7 = vsel %vm80_vm0, %v661_v5, 0  ;;  %v47_v9 = vand.u32 127, %v46_v8  ;;  %vm76_vm2 = vcmask 80896   ;;  %v662_v14 = vld [vmem:[#allocation4 + $0x78] sm:$0xff]   ;;  %v666_v18 = vld [vmem:[#allocation4 + $0x70] sm:$0xff]  }
  0x20   :  { %108 = vmatpush1.bf16.msra.mxu0 %v82_v6  ;;  %149 = vmatpush1.bf16.msra.mxu1 %v88_v7  ;;  %v663_v15 = vld [vmem:[#allocation4 + $0xf8] sm:$0xff]   ;;  %v667_v19 = vld [vmem:[#allocation4 + $0xf0] sm:$0xff]   ;;  %v670_v22 = vld [vmem:[#allocation4 + $0x68] sm:$0xff]  }
  0x21   :  { %v664_v16 = vld [vmem:[#allocation4 + $0x38] sm:$0xff]   ;;  %603 = vmatprep.subr.bf16.mxu0 %v662_v14  ;;  %625 = vmatprep.subr.bf16.mxu1 %v663_v15  ;;  %v668_v20 = vld [vmem:[#allocation4 + $0x30] sm:$0xff]   ;;  %v671_v23 = vld [vmem:[#allocation4 + $0xe8] sm:$0xff]  }
  0x22   :  { %v665_v17 = vld [vmem:[#allocation4 + $0xb8] sm:$0xff]   ;;  %v669_v21 = vld [vmem:[#allocation4 + $0xb0] sm:$0xff]   ;;  %v672_v24 = vld [vmem:[#allocation4 + $0x28] sm:$0xff]  }
  0x23   :  { %v673_v25 = vld [vmem:[#allocation4 + $0xa8] sm:$0xff]   ;;  %v674_v26 = vld [vmem:[#allocation4 + $0x60] sm:$0xff]   ;;  %v678_v30 = vld [vmem:[#allocation4 + $0x58] sm:$0xff]  }
  0x24   :  { %v675_v27 = vld [vmem:[#allocation4 + $0xe0] sm:$0xff]   ;;  %v679_v31 = vld [vmem:[#allocation4 + $0xd8] sm:$0xff]   ;;  %v682_v34 = vld [vmem:[#allocation4 + $0x50] sm:$0xff]  }
  0x25   :  { %v676_v28 = vld [vmem:[#allocation4 + $0x20] sm:$0xff]   ;;  %v680_v32 = vld [vmem:[#allocation4 + $0x18] sm:$0xff]   ;;  %v683_v35 = vld [vmem:[#allocation4 + $0xd0] sm:$0xff]  }
  0x26   :  { %v677_v29 = vld [vmem:[#allocation4 + $0xa0] sm:$0xff]   ;;  %v681_v33 = vld [vmem:[#allocation4 + $0x98] sm:$0xff]   ;;  %v684_v36 = vld [vmem:[#allocation4 + $0x10] sm:$0xff]  }
  0x27   :  { %v685_v37 = vld [vmem:[#allocation4 + $0x90] sm:$0xff]   ;;  %v686_v38 = vld [vmem:[#allocation4 + $0x48] sm:$0xff]   ;;  %v690_v42 = vld [vmem:[#allocation4 + $0x40] sm:$0xff]  }
  0x28   :  { %v687_v39 = vld [vmem:[#allocation4 + $0xc8] sm:$0xff]   ;;  %v691_v43 = vld [vmem:[#allocation4 + $0xc0] sm:$0xff]  }
  0x29   :  { %v688_v40 = vld [vmem:[#allocation4 + $0x8] sm:$0xff]   ;;  %v692_v44 = vld [vmem:[#allocation4] sm:$0xff]  }
  0x2a   :  { %v689_v41 = vld [vmem:[#allocation4 + $0x88] sm:$0xff]   ;;  %v693_v45 = vld [vmem:[#allocation4 + $0x80] sm:$0xff]  }
  0x99   :  { %v51_v10 = vpop.permute.xlu0 %50 }
  0x9a   :  { %vm52_vm1 = vcmp.eq.s32.totalorder %v47_v9, %v51_v10 }
  0x9b   :  { %v557_v12 = vsel %vm52_vm1, 1.0, %v761_v11 }
  0x9c   :  { %v55_v13 = vpack.c.bf16 %v557_v12, %v557_v12 }
  0x9e   :  { %563 = vmatmul.mubr.msk.bf16.vlgmr.msra.gmra.mxu0 %vm76_vm2, %v55_v13  ;;  %565 = vmatmul.mubr.msk.bf16.vlgmr.msra.gmra.mxu1 %vm76_vm2, %v55_v13 }
  0x9f   :  { %604 = vmatpush3.bf16.msra.mxu0 %v664_v16  ;;  %626 = vmatpush3.bf16.msra.mxu1 %v665_v17  ;;  %v570_v16 = vld [vmem:[%s805_s3] ss:$0 sm:$0xff] }
  0xa0   :  { %605 = vmatprep.subr.bf16.mxu0 %v666_v18  ;;  %627 = vmatprep.subr.bf16.mxu1 %v667_v19 }
  0xa3   :  { %606 = vmatpush3.bf16.msra.mxu0 %v668_v20  ;;  %628 = vmatpush3.bf16.msra.mxu1 %v669_v21 }
  0xa4   :  { %607 = vmatprep.subr.bf16.mxu0 %v670_v22  ;;  %629 = vmatprep.subr.bf16.mxu1 %v671_v23 }
  0xa7   :  { %608 = vmatpush3.bf16.msra.mxu0 %v672_v24  ;;  %630 = vmatpush3.bf16.msra.mxu1 %v673_v25 }
  0xa8   :  { %609 = vmatprep.subr.bf16.mxu0 %v674_v26  ;;  %631 = vmatprep.subr.bf16.mxu1 %v675_v27 }
  0xab   :  { %610 = vmatpush3.bf16.msra.mxu0 %v676_v28  ;;  %632 = vmatpush3.bf16.msra.mxu1 %v677_v29 }
  0xac   :  { %611 = vmatprep.subr.bf16.mxu0 %v678_v30  ;;  %633 = vmatprep.subr.bf16.mxu1 %v679_v31 }
  0xaf   :  { %612 = vmatpush3.bf16.msra.mxu0 %v680_v32  ;;  %634 = vmatpush3.bf16.msra.mxu1 %v681_v33 }
  0xb0   :  { %613 = vmatprep.subr.bf16.mxu0 %v682_v34  ;;  %635 = vmatprep.subr.bf16.mxu1 %v683_v35 }
  0xb3   :  { %614 = vmatpush3.bf16.msra.mxu0 %v684_v36  ;;  %636 = vmatpush3.bf16.msra.mxu1 %v685_v37 }
  0xb4   :  { %615 = vmatprep.subr.bf16.mxu0 %v686_v38  ;;  %637 = vmatprep.subr.bf16.mxu1 %v687_v39 }
  0xb7   :  { %616 = vmatpush3.bf16.msra.mxu0 %v688_v40  ;;  %638 = vmatpush3.bf16.msra.mxu1 %v689_v41 }
  0xb8   :  { %617 = vmatprep.subr.bf16.mxu0 %v690_v42  ;;  %639 = vmatprep.subr.bf16.mxu1 %v691_v43 }
  0xbb   :  { %618 = vmatpush3.bf16.msra.mxu0 %v692_v44  ;;  %640 = vmatpush3.bf16.msra.mxu1 %v693_v45 }
 0x15e   :  { %v127_v46 = vpop.f32.mrf.mxu0  ;;  %v168_v47 = vpop.f32.mrf.mxu1 }
 0x15f   :  { %v566_v48 = vmul.f32 -1.442695, %v127_v46  ;;  %v568_v49 = vmul.f32 -1.442695, %v168_v47 }
 0x160   :  { %v129_v50 = vpop.f32.mrf.mxu0  ;;  %v170_v51 = vpop.f32.mrf.mxu1 }
 0x161   :  { %694 = vpow2.f32 %v566_v48  ;;  %v567_v52 = vmul.f32 -1.442695, %v129_v50  ;;  %v569_v53 = vmul.f32 -1.442695, %v170_v51 }
 0x162   :  { %696 = vpow2.f32 %v568_v49  ;;  %v131_v54 = vpop.f32.mrf.mxu0  ;;  %v172_v55 = vpop.f32.mrf.mxu1 }
 0x163   :  { %698 = vpow2.f32 %v567_v52 }
 0x164   :  { %700 = vpow2.f32 %v569_v53  ;;  %v132_v56 = vpop.f32.mrf.mxu0  ;;  %v173_v57 = vpop.f32.mrf.mxu1 }
 0x16e   :  { %v695_v58 = vpop.eup %694 }
 0x16f   :  { %v697_v59 = vpop.eup %696  ;;  %v187_v60 = vadd.f32 1.0, %v695_v58 }
 0x170   :  { %v699_v61 = vpop.eup %698  ;;  %v189_v62 = vadd.f32 1.0, %v697_v59 }
 0x171   :  { %v701_v63 = vpop.eup %700  ;;  %702 = vrcp.f32 %v187_v60  ;;  %v188_v0 = vadd.f32 1.0, %v699_v61 }
 0x172   :  { %704 = vrcp.f32 %v189_v62  ;;  %v190_v1 = vadd.f32 1.0, %v701_v63 }
 0x173   :  { %706 = vrcp.f32 %v188_v0 }
 0x174   :  { %708 = vrcp.f32 %v190_v1 }
 0x17e   :  { %v703_v2 = vpop.eup %702 }
 0x17f   :  { %v705_v3 = vpop.eup %704  ;;  %v199_v5 = vmul.f32 %v703_v2, %v127_v46 }
 0x180   :  { %v707_v4 = vpop.eup %706  ;;  %v201_v7 = vmul.f32 %v705_v3, %v168_v47 }
 0x181   :  { %v709_v6 = vpop.eup %708  ;;  %v200_v8 = vmul.f32 %v707_v4, %v129_v50  ;;  %v203_v11 = vpack.c.bf16 %v199_v5, %v199_v5 }
 0x182   :  { %v202_v9 = vmul.f32 %v709_v6, %v170_v51  ;;  %v205_v13 = vpack.c.bf16 %v201_v7, %v201_v7 }
 0x183   :  { %v204_v10 = vpack.c.bf16 %v200_v8, %v200_v8 }
 0x184   :  { %v206_v12 = vpack.c.bf16 %v202_v9, %v202_v9 }
 0x185   :  { %502 = vmatprep.mubr.bf16.mxu0 %v204_v10 }
 0x186   :  { %542 = vmatprep.mubr.bf16.mxu1 %v206_v12  ;;  %503 = vmatmul.mubr.bf16.vlgmr.msra.gmra.mxu0 %v203_v11 }
 0x187   :  { %543 = vmatmul.mubr.bf16.vlgmr.msra.gmra.mxu1 %v205_v13 }
 0x246   :  { %v619_v14 = vpop.f32.mrf.mxu0 }
 0x247   :  { %v641_v15 = vpop.f32.mrf.mxu1 }
 0x248   :  { %v620_v17 = vpop.f32.mrf.mxu0 }
 0x249   :  { %v621_v18 = vadd.f32 %v620_v17, %v619_v14  ;;  %v642_v19 = vpop.f32.mrf.mxu1 }
 0x24a   :  { %v622_v20 = vpop.f32.mrf.mxu0  ;;  %v643_v22 = vadd.f32 %v642_v19, %v641_v15 }
 0x24b   :  { %v505_v21 = vadd.f32 %v621_v18, %v570_v16  ;;  %v644_v23 = vpop.f32.mrf.mxu1 }
 0x24c   :  { %v623_v24 = vpop.f32.mrf.mxu0 }
 0x24d   :  { %v545_v25 = vadd.f32 %v643_v22, %v505_v21  ;;  %v645_v26 = vpop.f32.mrf.mxu1 }
 0x24f   :  { %550 = vst [vmem:[%s806_s4] sm:$0xff] %v545_v25 }
 0x250   :  { %555 = vsyncpa [#allocation3], 1 }
 0x251   :  { %556 = vsyncpa [#allocation5], 1 }

</bundles_post_ra>
